<compile_context>
chip_gen: v7x
topology: tpu7x:2x2x1
jax: 0.10.0
libtpu: 0.0.40
codegen_flags: <defaults>
</compile_context>

<pallas_src>
import functools

import jax
import jax.numpy as jnp
from jax import lax
from jax.experimental import pallas as pl
from jax.experimental.pallas import tpu as pltpu


def _ntxent_kernel(zis_ref, zjs_ref, out_ref, *scratch,
                   inv_t, batch_size, row_block, norm, mxu_dtype):
    if norm:
        h2_cache_ref = scratch[0]
        col_sum_ref, col_max_ref, row_acc_ref, diag_acc_ref = scratch[1:]
    else:
        h2_cache_ref = None
        col_sum_ref, col_max_ref, row_acc_ref, diag_acc_ref = scratch

    i = pl.program_id(0)
    nsteps = pl.num_programs(0)
    inv_t = jnp.float32(inv_t)

    @pl.when(i == 0)
    def _init():
        col_sum_ref[...] = jnp.zeros_like(col_sum_ref)
        row_acc_ref[...] = jnp.zeros_like(row_acc_ref)
        diag_acc_ref[...] = jnp.zeros_like(diag_acc_ref)
        if not norm:
            col_max_ref[...] = jnp.full(col_max_ref.shape, -jnp.inf,
                                        col_max_ref.dtype)
        if norm:
            # Normalize + cast the full view-2 matrix ONCE; all later row
            # tiles reuse it from VMEM (removes per-step O(B*D) VPU work).
            # F.normalize(x, 2, 1) == x * rsqrt(max(||x||^2, eps^2)), eps=1e-12
            x2 = zjs_ref[...].astype(jnp.float32)
            inv2 = lax.rsqrt(
                jnp.maximum(jnp.sum(x2 * x2, axis=1, keepdims=True), 1e-24))
            h2_cache_ref[...] = (x2 * inv2).astype(mxu_dtype)

    x1 = zis_ref[...].astype(jnp.float32)          # (tq, D) row tile of view 1
    if norm:
        inv1 = lax.rsqrt(jnp.maximum(jnp.sum(x1 * x1, axis=1, keepdims=True),
                                     1e-24))
        h1 = x1 * (inv1 * inv_t)                   # fold 1/T into the small side
        h2m = h2_cache_ref[...]                    # cached normalized (B, D)
    else:
        h1 = x1 * inv_t
        h2m = zjs_ref[...].astype(mxu_dtype)       # raw view 2, no extra work

    # Single similarity tile: S = (h1/T) @ h2^T  ->  (tq, B).  logits_ba == S^T.
    s = lax.dot_general(h1.astype(mxu_dtype), h2m,
                        dimension_numbers=(((1,), (1,)), ((), ())),
                        preferred_element_type=jnp.float32)

    # Positive-pair numerator = diagonal entries of this row tile, computed
    # elementwise in f32 (no one-hot labels, no logprobs; tq*D work only).
    start = pl.multiple_of(i * row_block, row_block)
    x2_tile = zjs_ref[pl.ds(start, row_block), :].astype(jnp.float32)
    if norm:
        inv2t = lax.rsqrt(
            jnp.maximum(jnp.sum(x2_tile * x2_tile, axis=1, keepdims=True), 1e-24))
        h2_tile = x2_tile * inv2t
    else:
        h2_tile = x2_tile
    diag_acc_ref[...] = diag_acc_ref[...] + jnp.sum(h1 * h2_tile, keepdims=True)

    if norm:
        # Normalized logits are bounded by +-1/T -> constant shift is safe; a
        # single exp pass feeds both the row-LSE and the column accumulators.
        e = jnp.exp(s - inv_t)
        row_lse = jnp.log(jnp.sum(e, axis=1, keepdims=True)) + inv_t     # (tq, 1)
        row_acc_ref[...] = row_acc_ref[...] + jnp.sum(row_lse, keepdims=True)
        col_sum_ref[...] = col_sum_ref[...] + jnp.sum(e, axis=0, keepdims=True)
    else:
        # Unbounded logits: keep max shifts; flash-style online column LSE.
        rmax = jnp.max(s, axis=1, keepdims=True)
        row_lse = jnp.log(jnp.sum(jnp.exp(s - rmax), axis=1, keepdims=True)) + rmax
        row_acc_ref[...] = row_acc_ref[...] + jnp.sum(row_lse, keepdims=True)
        cmax_old = col_max_ref[...]
        cmax_new = jnp.maximum(cmax_old, jnp.max(s, axis=0, keepdims=True))
        col_sum_ref[...] = (col_sum_ref[...] * jnp.exp(cmax_old - cmax_new)
                            + jnp.sum(jnp.exp(s - cmax_new), axis=0, keepdims=True))
        col_max_ref[...] = cmax_new

    @pl.when(i == nsteps - 1)
    def _finalize():
        if norm:
            col_lse = (jnp.sum(jnp.log(col_sum_ref[...]), keepdims=True)
                       + inv_t * jnp.float32(batch_size))
        else:
            col_lse = jnp.sum(jnp.log(col_sum_ref[...]) + col_max_ref[...],
                              keepdims=True)
        # loss_a + loss_b = (sum(row_lse) + sum(col_lse) - 2 * sum(diag)) / B
        total = row_acc_ref[...] + col_lse - 2.0 * diag_acc_ref[...]
        out_ref[...] = total * (1.0 / batch_size)


def ntxent_loss(zis, zjs, temperature=0.5, alpha_weight=1.0, norm=True,
                row_block=None):
    """Pallas TPU forward of NTXentLoss (cross-view NT-Xent, SimCLR-style).

    zis, zjs: (B, D) feature matrices. Returns a scalar float32 loss.
    alpha_weight is accepted for signature parity but — exactly like the
    reference module's forward — is not used.
    """
    assert zis.ndim == 2 and zis.shape == zjs.shape
    B, D = zis.shape

    # Row tile: full batch when small, else the largest divisor (<=256, mult of
    # 8) so blocks stay (8,128)-aligned and VMEM-sized for production B.
    if row_block is not None:
        tq = int(row_block)
    elif B <= 256:
        tq = B
    else:
        tq = B
        for cand in (256, 128, 64, 32, 16, 8):
            if B % cand == 0:
                tq = cand
                break
    assert B % tq == 0, f"row_block {tq} must divide batch {B}"
    grid = (B // tq,)

    # Feed the MXU in bf16 when inputs are bf16 (v6e/v7x fast path); all
    # VPU/EUP math stays f32 (v5e has no bf16 VPU/EUP path).
    mxu_dtype = (jnp.bfloat16
                 if (zis.dtype == jnp.bfloat16 and zjs.dtype == jnp.bfloat16)
                 else jnp.float32)
    mxu_bytes = jnp.dtype(mxu_dtype).itemsize

    kernel = functools.partial(
        _ntxent_kernel,
        inv_t=float(1.0 / temperature),
        batch_size=B,
        row_block=tq,
        norm=bool(norm),
        mxu_dtype=mxu_dtype,
    )

    scratch_shapes = []
    if norm:
        scratch_shapes.append(pltpu.VMEM((B, D), mxu_dtype))  # normalized h2 cache
    scratch_shapes += [
        pltpu.VMEM((1, B), jnp.float32),   # column exp-sum accumulator
        pltpu.VMEM((1, B), jnp.float32),   # column running max (norm=False)
        pltpu.VMEM((1, 1), jnp.float32),   # sum of row LSEs
        pltpu.VMEM((1, 1), jnp.float32),   # sum of positive-pair logits
    ]

    # Resident-footprint estimate (pipelined inputs + h2 cache + S/E temporaries
    # + scratch) used to raise the scoped VMEM limit when needed (16 MiB v5e /
    # 32 MiB v6e,v7x defaults); never request below 32 MiB.
    in_bytes = jnp.dtype(zis.dtype).itemsize
    est = (2 * tq * D * in_bytes + 2 * B * D * in_bytes
           + (B * D * mxu_bytes if norm else 0)
           + 8 * tq * B * 4 + 8 * B * 4 + (1 << 16))
    vmem_limit = int(min(100 * 2**20, max(32 * 2**20, 2 * est)))

    out = pl.pallas_call(
        kernel,
        out_shape=jax.ShapeDtypeStruct((1, 1), jnp.float32),
        grid_spec=pltpu.PrefetchScalarGridSpec(
            num_scalar_prefetch=0,
            grid=grid,
            in_specs=[
                pl.BlockSpec((tq, D), lambda i: (i, 0)),   # h1 row tile
                pl.BlockSpec((B, D), lambda i: (0, 0)),    # h2 resident
            ],
            out_specs=pl.BlockSpec((1, 1), lambda i: (0, 0)),
            scratch_shapes=scratch_shapes),
        compiler_params=pltpu.CompilerParams(
            # Scratch/output accumulate across row tiles -> reduction axis.
            # TODO(synk): mark this axis "parallel" for v7x dual-TC once the
            # column-LSE partials get a cross-core reduction.
            dimension_semantics=("arbitrary",),
            vmem_limit_bytes=vmem_limit),
    )(zis, zjs)
    return out[0, 0]


def _reference_loss(zis, zjs, temperature, norm=True):
    # Pure-JAX reference mirroring the PyTorch forward (HIGHEST matmul precision
    # so the comparison is against true-f32 logits).
    zis = zis.astype(jnp.float32)
    zjs = zjs.astype(jnp.float32)
    if norm:
        def normalize(x):
            n = jnp.sqrt(jnp.sum(x * x, axis=1, keepdims=True))
            return x / jnp.maximum(n, 1e-12)
        h1, h2 = normalize(zis), normalize(zjs)
    else:
        h1, h2 = zis, zjs
    B = h1.shape[0]
    labels = jnp.eye(B, dtype=jnp.float32)
    logits_ab = jnp.matmul(h1, h2.T, precision=lax.Precision.HIGHEST) / temperature
    logits_ba = jnp.matmul(h2, h1.T, precision=lax.Precision.HIGHEST) / temperature

    def soft_xent(logits):
        logprobs = jax.nn.log_softmax(logits, axis=-1)
        return -jnp.sum(labels * logprobs) / B

    return soft_xent(logits_ab) + soft_xent(logits_ba)


if __name__ == "__main__":
    key = jax.random.PRNGKey(0)
    k1, k2, k3, k4 = jax.random.split(key, 4)
    temperature = 0.5
    # Tolerance absorbs MXU-vs-reference matmul rounding differences only; any
    # algorithmic error would be orders of magnitude larger.
    rtol = atol = 1e-3

    # 1) Module-default shapes: batch=8, hidden=32, norm=True (single tile).
    B, D = 8, 32
    zis = jax.random.normal(k1, (B, D), dtype=jnp.float32)
    zjs = jax.random.normal(k2, (B, D), dtype=jnp.float32)
    loss = jax.block_until_ready(ntxent_loss(zis, zjs, temperature=temperature,
                                             alpha_weight=1.0))
    ref = _reference_loss(zis, zjs, temperature, norm=True)
    assert jnp.allclose(loss, ref, rtol=rtol, atol=atol), (loss, ref)

    # 2) Multi-tile grid path (4 row tiles), norm=True (cached h2 + shared exp).
    B2, D2 = 32, 64
    a = jax.random.normal(k3, (B2, D2), dtype=jnp.float32)
    b = jax.random.normal(k4, (B2, D2), dtype=jnp.float32)
    loss2 = jax.block_until_ready(
        ntxent_loss(a, b, temperature=temperature, row_block=8))
    ref2 = _reference_loss(a, b, temperature, norm=True)
    assert jnp.allclose(loss2, ref2, rtol=rtol, atol=atol), (loss2, ref2)

    # 3) norm=False path (max-shifted rows + online running-max column LSE).
    a3, b3 = a * 0.1, b * 0.1
    loss3 = jax.block_until_ready(
        ntxent_loss(a3, b3, temperature=temperature, norm=False, row_block=8))
    ref3 = _reference_loss(a3, b3, temperature, norm=False)
    assert jnp.allclose(loss3, ref3, rtol=rtol, atol=atol), (loss3, ref3)

    # 4) bf16 inputs (bf16 MXU path, cached bf16-normalized h2); looser
    #    tolerance for bf16 matmul rounding.
    a4 = a.astype(jnp.bfloat16)
    b4 = b.astype(jnp.bfloat16)
    loss4 = jax.block_until_ready(
        ntxent_loss(a4, b4, temperature=temperature, row_block=8))
    ref4 = _reference_loss(a4, b4, temperature, norm=True)
    assert jnp.allclose(loss4, ref4, rtol=2e-2, atol=2e-2), (loss4, ref4)

    print("KERNEL_OK")
</pallas_src>

<mosaic_0001>
module attributes {stable_mosaic.version = 11 : i64} {
  func.func @_ntxent_kernel(%arg0: i32, %arg1: memref<8x32xf32, #tpu.memory_space<vmem>>, %arg2: memref<8x32xf32, #tpu.memory_space<vmem>>, %arg3: memref<1x1xf32, #tpu.memory_space<vmem>>, %arg4: memref<8x32xf32, #tpu.memory_space<vmem>>, %arg5: memref<1x8xf32, #tpu.memory_space<vmem>>, %arg6: memref<1x8xf32, #tpu.memory_space<vmem>>, %arg7: memref<1x1xf32, #tpu.memory_space<vmem>>, %arg8: memref<1x1xf32, #tpu.memory_space<vmem>>) attributes {dimension_semantics = [#tpu.dimension_semantics<arbitrary>], iteration_bounds = array<i64: 1>, scalar_prefetch = 0 : i64, scratch_operands = 5 : i64, tpu.core_type = #tpu.core_type<tc>, window_params = [{transform_indices = @transform_0, window_bounds = array<i64: 8, 32>}, {pipeline_mode = #tpu.pipeline_mode<synchronous>, transform_indices = @transform_1, window_bounds = array<i64: 8, 32>}, {pipeline_mode = #tpu.pipeline_mode<synchronous>, transform_indices = @transform_2, window_bounds = array<i64: 1, 1>}]} {
    %c0_i32 = arith.constant 0 : i32
    %0 = arith.cmpi eq, %arg0, %c0_i32 : i32
    %1 = arith.extui %0 : i1 to i32
    %c0_i32_0 = arith.constant 0 : i32
    %2 = arith.cmpi ne, %1, %c0_i32_0 : i32
    scf.if %2 {
      %cst_31 = arith.constant 0.000000e+00 : f32
      %61 = vector.broadcast %cst_31 : f32 to vector<1x8xf32>
      %c0_32 = arith.constant 0 : index
      %c0_33 = arith.constant 0 : index
      %62 = vector.load %arg5[%c0_32, %c0_33] : memref<1x8xf32, #tpu.memory_space<vmem>>, vector<1x8xf32>
      tpu.vector_store %arg5[%c0_32, %c0_33], %61 {strides = array<i32>} : memref<1x8xf32, #tpu.memory_space<vmem>>, vector<1x8xf32>,
      %cst_34 = arith.constant 0.000000e+00 : f32
      %63 = vector.broadcast %cst_34 : f32 to vector<1x1xf32>
      %c0_35 = arith.constant 0 : index
      %c0_36 = arith.constant 0 : index
      %64 = vector.load %arg7[%c0_35, %c0_36] : memref<1x1xf32, #tpu.memory_space<vmem>>, vector<1x1xf32>
      tpu.vector_store %arg7[%c0_35, %c0_36], %63 {strides = array<i32>} : memref<1x1xf32, #tpu.memory_space<vmem>>, vector<1x1xf32>,
      %cst_37 = arith.constant 0.000000e+00 : f32
      %65 = vector.broadcast %cst_37 : f32 to vector<1x1xf32>
      %c0_38 = arith.constant 0 : index
      %c0_39 = arith.constant 0 : index
      %66 = vector.load %arg8[%c0_38, %c0_39] : memref<1x1xf32, #tpu.memory_space<vmem>>, vector<1x1xf32>
      tpu.vector_store %arg8[%c0_38, %c0_39], %65 {strides = array<i32>} : memref<1x1xf32, #tpu.memory_space<vmem>>, vector<1x1xf32>,
      %c0_40 = arith.constant 0 : index
      %c0_41 = arith.constant 0 : index
      %67 = vector.load %arg2[%c0_40, %c0_41] : memref<8x32xf32, #tpu.memory_space<vmem>>, vector<8x32xf32>
      %68 = arith.mulf %67, %67 : vector<8x32xf32>
      %cst_42 = arith.constant dense<0.000000e+00> : vector<8xf32>
      %69 = vector.multi_reduction <add>, %68, %cst_42 [1] : vector<8x32xf32> to vector<8xf32>
      %70 = vector.shape_cast %69 : vector<8xf32> to vector<8x1xf32>
      %cst_43 = arith.constant 1.000000e-24 : f32
      %71 = vector.broadcast %cst_43 : f32 to vector<8x1xf32>
      %72 = arith.maximumf %70, %71 : vector<8x1xf32>
      %73 = math.rsqrt %72 : vector<8x1xf32>
      %74 = vector.broadcast %73 : vector<8x1xf32> to vector<8x32xf32>
      %75 = arith.mulf %67, %74 : vector<8x32xf32>
      %c0_44 = arith.constant 0 : index
      %c0_45 = arith.constant 0 : index
      %76 = vector.load %arg4[%c0_44, %c0_45] : memref<8x32xf32, #tpu.memory_space<vmem>>, vector<8x32xf32>
      tpu.vector_store %arg4[%c0_44, %c0_45], %75 {strides = array<i32>} : memref<8x32xf32, #tpu.memory_space<vmem>>, vector<8x32xf32>,
    } else {
    }
    %c0 = arith.constant 0 : index
    %c0_1 = arith.constant 0 : index
    %3 = vector.load %arg1[%c0, %c0_1] : memref<8x32xf32, #tpu.memory_space<vmem>>, vector<8x32xf32>
    %4 = arith.mulf %3, %3 : vector<8x32xf32>
    %cst = arith.constant dense<0.000000e+00> : vector<8xf32>
    %5 = vector.multi_reduction <add>, %4, %cst [1] : vector<8x32xf32> to vector<8xf32>
    %6 = vector.shape_cast %5 : vector<8xf32> to vector<8x1xf32>
    %cst_2 = arith.constant 1.000000e-24 : f32
    %7 = vector.broadcast %cst_2 : f32 to vector<8x1xf32>
    %8 = arith.maximumf %6, %7 : vector<8x1xf32>
    %9 = math.rsqrt %8 : vector<8x1xf32>
    %cst_3 = arith.constant 2.000000e+00 : f32
    %10 = vector.broadcast %cst_3 : f32 to vector<8x1xf32>
    %11 = arith.mulf %9, %10 : vector<8x1xf32>
    %12 = vector.broadcast %11 : vector<8x1xf32> to vector<8x32xf32>
    %13 = arith.mulf %3, %12 : vector<8x32xf32>
    %c0_4 = arith.constant 0 : index
    %c0_5 = arith.constant 0 : index
    %14 = vector.load %arg4[%c0_4, %c0_5] : memref<8x32xf32, #tpu.memory_space<vmem>>, vector<8x32xf32>
    %cst_6 = arith.constant dense<0.000000e+00> : vector<8x8xf32>
    %15 = tpu.matmul %13, %14, %cst_6 {dimension_numbers = #tpu.dot_dimension_numbers<[1], [1], [0], [0], [0, 0, 1, 0], [], []>} : vector<8x32xf32>, vector<8x32xf32>, vector<8x8xf32> -> vector<8x8xf32>
    %c8_i32 = arith.constant 8 : i32
    %16 = arith.muli %arg0, %c8_i32 : i32
    %17 = tpu.assume_multiple %16, 8 : i32
    %18 = arith.index_cast %17 : i32 to index
    %c0_7 = arith.constant 0 : index
    %19 = vector.load %arg2[%18, %c0_7] : memref<8x32xf32, #tpu.memory_space<vmem>>, vector<8x32xf32>
    %20 = arith.mulf %19, %19 : vector<8x32xf32>
    %cst_8 = arith.constant dense<0.000000e+00> : vector<8xf32>
    %21 = vector.multi_reduction <add>, %20, %cst_8 [1] : vector<8x32xf32> to vector<8xf32>
    %22 = vector.shape_cast %21 : vector<8xf32> to vector<8x1xf32>
    %cst_9 = arith.constant 1.000000e-24 : f32
    %23 = vector.broadcast %cst_9 : f32 to vector<8x1xf32>
    %24 = arith.maximumf %22, %23 : vector<8x1xf32>
    %25 = math.rsqrt %24 : vector<8x1xf32>
    %26 = vector.broadcast %25 : vector<8x1xf32> to vector<8x32xf32>
    %27 = arith.mulf %19, %26 : vector<8x32xf32>
    %c0_10 = arith.constant 0 : index
    %c0_11 = arith.constant 0 : index
    %28 = vector.load %arg8[%c0_10, %c0_11] : memref<1x1xf32, #tpu.memory_space<vmem>>, vector<1x1xf32>
    %29 = arith.mulf %13, %27 : vector<8x32xf32>
    %30 = vector.shape_cast %29 : vector<8x32xf32> to vector<1x8x32xf32>
    %cst_12 = arith.constant dense<0.000000e+00> : vector<1xf32>
    %31 = vector.multi_reduction <add>, %30, %cst_12 [1, 2] : vector<1x8x32xf32> to vector<1xf32>
    %32 = vector.shape_cast %31 : vector<1xf32> to vector<1x1x1xf32>
    %33 = vector.extract %32[0, 0, 0] : f32 from vector<1x1x1xf32>
    %34 = vector.broadcast %33 : f32 to vector<1x1xf32>
    %35 = arith.addf %28, %34 : vector<1x1xf32>
    %c0_13 = arith.constant 0 : index
    %c0_14 = arith.constant 0 : index
    %36 = vector.load %arg8[%c0_13, %c0_14] : memref<1x1xf32, #tpu.memory_space<vmem>>, vector<1x1xf32>
    tpu.vector_store %arg8[%c0_13, %c0_14], %35 {strides = array<i32>} : memref<1x1xf32, #tpu.memory_space<vmem>>, vector<1x1xf32>,
    %cst_15 = arith.constant 2.000000e+00 : f32
    %37 = vector.broadcast %cst_15 : f32 to vector<8x8xf32>
    %38 = arith.subf %15, %37 : vector<8x8xf32>
    %39 = math.exp %38 : vector<8x8xf32>
    %cst_16 = arith.constant dense<0.000000e+00> : vector<8xf32>
    %40 = vector.multi_reduction <add>, %39, %cst_16 [1] : vector<8x8xf32> to vector<8xf32>
    %41 = vector.shape_cast %40 : vector<8xf32> to vector<8x1xf32>
    %42 = math.log %41 : vector<8x1xf32>
    %cst_17 = arith.constant 2.000000e+00 : f32
    %43 = vector.broadcast %cst_17 : f32 to vector<8x1xf32>
    %44 = arith.addf %42, %43 : vector<8x1xf32>
    %c0_18 = arith.constant 0 : index
    %c0_19 = arith.constant 0 : index
    %45 = vector.load %arg7[%c0_18, %c0_19] : memref<1x1xf32, #tpu.memory_space<vmem>>, vector<1x1xf32>
    %46 = vector.shape_cast %44 : vector<8x1xf32> to vector<1x8x1xf32>
    %cst_20 = arith.constant dense<0.000000e+00> : vector<1xf32>
    %47 = vector.multi_reduction <add>, %46, %cst_20 [1, 2] : vector<1x8x1xf32> to vector<1xf32>
    %48 = vector.shape_cast %47 : vector<1xf32> to vector<1x1x1xf32>
    %49 = vector.extract %48[0, 0, 0] : f32 from vector<1x1x1xf32>
    %50 = vector.broadcast %49 : f32 to vector<1x1xf32>
    %51 = arith.addf %45, %50 : vector<1x1xf32>
    %c0_21 = arith.constant 0 : index
    %c0_22 = arith.constant 0 : index
    %52 = vector.load %arg7[%c0_21, %c0_22] : memref<1x1xf32, #tpu.memory_space<vmem>>, vector<1x1xf32>
    tpu.vector_store %arg7[%c0_21, %c0_22], %51 {strides = array<i32>} : memref<1x1xf32, #tpu.memory_space<vmem>>, vector<1x1xf32>,
    %c0_23 = arith.constant 0 : index
    %c0_24 = arith.constant 0 : index
    %53 = vector.load %arg5[%c0_23, %c0_24] : memref<1x8xf32, #tpu.memory_space<vmem>>, vector<1x8xf32>
    %cst_25 = arith.constant dense<0.000000e+00> : vector<8xf32>
    %54 = vector.multi_reduction <add>, %39, %cst_25 [0] : vector<8x8xf32> to vector<8xf32>
    %55 = vector.shape_cast %54 : vector<8xf32> to vector<1x8xf32>
    %56 = arith.addf %53, %55 : vector<1x8xf32>
    %c0_26 = arith.constant 0 : index
    %c0_27 = arith.constant 0 : index
    %57 = vector.load %arg5[%c0_26, %c0_27] : memref<1x8xf32, #tpu.memory_space<vmem>>, vector<1x8xf32>
    tpu.vector_store %arg5[%c0_26, %c0_27], %56 {strides = array<i32>} : memref<1x8xf32, #tpu.memory_space<vmem>>, vector<1x8xf32>,
    %c0_i32_28 = arith.constant 0 : i32
    %58 = arith.cmpi eq, %arg0, %c0_i32_28 : i32
    %59 = arith.extui %58 : i1 to i32
    %cst_29 = arith.constant 2.000000e+00 : f32
    %c0_i32_30 = arith.constant 0 : i32
    %60 = arith.cmpi ne, %59, %c0_i32_30 : i32
    scf.if %60 {
      %c0_31 = arith.constant 0 : index
      %c0_32 = arith.constant 0 : index
      %61 = vector.load %arg5[%c0_31, %c0_32] : memref<1x8xf32, #tpu.memory_space<vmem>>, vector<1x8xf32>
      %62 = math.log %61 : vector<1x8xf32>
      %63 = vector.shape_cast %62 : vector<1x8xf32> to vector<1x1x8xf32>
      %cst_33 = arith.constant dense<0.000000e+00> : vector<1xf32>
      %64 = vector.multi_reduction <add>, %63, %cst_33 [1, 2] : vector<1x1x8xf32> to vector<1xf32>
      %65 = vector.shape_cast %64 : vector<1xf32> to vector<1x1x1xf32>
      %66 = vector.extract %65[0, 0, 0] : f32 from vector<1x1x1xf32>
      %67 = vector.broadcast %66 : f32 to vector<1x1xf32>
      %cst_34 = arith.constant 8.000000e+00 : f32
      %68 = arith.mulf %cst_29, %cst_34 : f32
      %69 = vector.broadcast %68 : f32 to vector<1x1xf32>
      %70 = arith.addf %67, %69 : vector<1x1xf32>
      %c0_35 = arith.constant 0 : index
      %c0_36 = arith.constant 0 : index
      %71 = vector.load %arg7[%c0_35, %c0_36] : memref<1x1xf32, #tpu.memory_space<vmem>>, vector<1x1xf32>
      %72 = arith.addf %71, %70 : vector<1x1xf32>
      %c0_37 = arith.constant 0 : index
      %c0_38 = arith.constant 0 : index
      %73 = vector.load %arg8[%c0_37, %c0_38] : memref<1x1xf32, #tpu.memory_space<vmem>>, vector<1x1xf32>
      %cst_39 = arith.constant 2.000000e+00 : f32
      %74 = vector.broadcast %cst_39 : f32 to vector<1x1xf32>
      %75 = arith.mulf %74, %73 : vector<1x1xf32>
      %76 = arith.subf %72, %75 : vector<1x1xf32>
      %cst_40 = arith.constant 1.250000e-01 : f32
      %77 = vector.broadcast %cst_40 : f32 to vector<1x1xf32>
      %78 = arith.mulf %76, %77 : vector<1x1xf32>
      %c0_41 = arith.constant 0 : index
      %c0_42 = arith.constant 0 : index
      %79 = vector.load %arg3[%c0_41, %c0_42] : memref<1x1xf32, #tpu.memory_space<vmem>>, vector<1x1xf32>
      tpu.vector_store %arg3[%c0_41, %c0_42], %78 {strides = array<i32>} : memref<1x1xf32, #tpu.memory_space<vmem>>, vector<1x1xf32>,
    } else {
    }
    return
  }
  func.func @transform_0(%arg0: i32) -> (i32, i32) {
    %c0_i32 = arith.constant 0 : i32
    %c0_i32_0 = arith.constant 0 : i32
    return %arg0, %c0_i32 : i32, i32
  }
  func.func @transform_1(%arg0: i32) -> (i32, i32) {
    %c0_i32 = arith.constant 0 : i32
    %c0_i32_0 = arith.constant 0 : i32
    %c0_i32_1 = arith.constant 0 : i32
    return %c0_i32, %c0_i32_0 : i32, i32
  }
  func.func @transform_2(%arg0: i32) -> (i32, i32) {
    %c0_i32 = arith.constant 0 : i32
    %c0_i32_0 = arith.constant 0 : i32
    %c0_i32_1 = arith.constant 0 : i32
    return %c0_i32, %c0_i32_0 : i32, i32
  }
}

</mosaic_0001>

<bundles_post_ra>
// kernel: tpu_custom_call.1
= control target key start
LH: loop header
LB: loop body
LE: loop exit
PB: predicated region body
PF: predicated region fallthrough
CT: control target
= control target key end

     0   :  { %7 = vsyncpa [#allocation8], 0  ;;  %s419_s0 = inlined_call_operand.hbm [shape: f32[8,32], index: 0, kind: input, shape index: {}]   ;;  %s420_s1 = inlined_call_operand.hbm [shape: f32[8,32], index: 1, kind: input, shape index: {}]   ;;  %s421_s2 = inlined_call_operand.hbm [shape: f32[1,1], index: 2, kind: output, shape index: {}]  }
   0x1   :  { %8 = vsyncpa [#allocation11], 0 }
   0x2   :  { %9 = vsyncpa [#allocation9], 0  ;;  %s349_s9 = smov [#allocation7]   ;;  %s350_s11 = smov [#allocation10]  }
   0x3   :  { %s16_s10 = sshll.u32 %s349_s9, 4  ;;  %s26_s12 = sshll.u32 %s350_s11, 4  ;;  %s17_s10 = int_to_ptr.vmem [resolvable:$true] %s16_s10  ;;  %s27_s12 = int_to_ptr.vmem [resolvable:$true] %s26_s12 }
   0x4   :  { %s277_s15 = scalar_lea.hbm %s419_s0, 128 }
   0x5   :  { %p278_p0 = scmp.ne.s32.totalorder %s419_s0, %s277_s15  ;;  %p281_p1 = scmp.lt.u32.totalorder %s277_s15, %s419_s0 }
   0x7   :  { %p283_p2 = pnand %p281_p1, %p278_p0 }
   0x9   :  { %286 = shalt.err (!%p283_p2)
}
   0xa   :  { %s287_s20 = scalar_lea.vmem %s17_s10, 128  ;;  %p292_p4 = scmp.lt.s32.totalorder %s17_s10, %s17_s10 }
   0xb   :  { %p288_p3 = scmp.ne.s32.totalorder %s17_s10, %s287_s20  ;;  %p293_p5 = scmp.lt.s32.totalorder %s287_s20, %s287_s20 }
   0xd   :  { %p294_p6 = por %p293_p5, %p292_p4 }
   0xf   :  { %p295_p7 = pnand %p294_p6, %p288_p3 }
  0x11   :  { %298 = shalt.err (!%p295_p7)
}
  0x12   :  { %19 = dma.hbm_to_vmem [thread:$0]  %s419_s0, 128, %s17_s10, [#allocation8]  }
  0x13   :  { %s299_s25 = scalar_lea.hbm %s420_s1, 128 }
  0x14   :  { %p300_p8 = scmp.ne.s32.totalorder %s420_s1, %s299_s25  ;;  %p303_p9 = scmp.lt.u32.totalorder %s299_s25, %s420_s1 }
  0x16   :  { %p305_p10 = pnand %p303_p9, %p300_p8 }
  0x18   :  { %308 = shalt.err (!%p305_p10)
}
  0x19   :  { %s309_s30 = scalar_lea.vmem %s27_s12, 128  ;;  %p314_p12 = scmp.lt.s32.totalorder %s27_s12, %s27_s12 }
  0x1a   :  { %p310_p11 = scmp.ne.s32.totalorder %s27_s12, %s309_s30  ;;  %p315_p13 = scmp.lt.s32.totalorder %s309_s30, %s309_s30 }
  0x1c   :  { %p316_p0 = por %p315_p13, %p314_p12 }
  0x1e   :  { %p317_p1 = pnand %p316_p0, %p310_p11 }
  0x20   :  { %320 = shalt.err (!%p317_p1)
}
  0x21   :  { %29 = dma.hbm_to_vmem [thread:$0]  %s420_s1, 128, %s27_s12, [#allocation11]  }
  0x22   :  { %343 = dma.done.wait [#allocation8], 128  }
  0x23   :  { %344 = vsyncadd [#allocation8], 4294967168 }
  0x24   :  { %345 = dma.done.wait [#allocation11], 128  }
  0x25   :  { %346 = vsyncadd [#allocation11], 4294967168  ;;  %v45_v0 = vld [vmem:[#allocation10] sm:$0xff]  ;;  %vm47_vm0 = vcmask 261120   ;;  %v55_v1 = vld [vmem:[#allocation7] sm:$0xff]  ;;  %v351_v6 = vmov 0.0  }
  0x26   :  { %v46_v2 = vmul.f32 %v45_v0, %v45_v0  ;;  %v56_v3 = vmul.f32 %v55_v1, %v55_v1  ;;  %249 = vmatprep.subr.mxu0 %v351_v6  ;;  %vm352_vm1 = vmmov 0   ;;  %vm42_vm2 = vcmask 0   ;;  %s353_s6 = smov [#allocation12]  }
  0x27   :  { %251 = vmatprep.mubr.msk.f32.mxu0 %vm352_vm1, %v351_v6  ;;  %44 = vst.msk [vmem:[#allocation6] sm:$0x1] %vm42_vm2, %v351_v6  ;;  %43 = vst.msk [vmem:[#allocation5] sm:$0x1] %vm42_vm2, %v351_v6  ;;  %vm40_vm3 = vcmask 57344   ;;  %vm171_vm4 = vcmask 64512  }
  0x28   :  { %v48_v4 = vsel %vm47_vm0, %v46_v2, 0.0  ;;  %v58_v5 = vsel %vm47_vm0, %v56_v3, 0.0  ;;  %41 = vst.msk [vmem:[#allocation3] sm:$0x1] %vm40_vm3, %v351_v6  ;;  %vm179_vm5 = vcmask 7168   ;;  %s234_s7 = sshll.u32 %s353_s6, 4  ;;  %s235_s7 = int_to_ptr.vmem [resolvable:$true] %s234_s7 }
  0x29   :  { %49 = vadd.xlane.f32.xlu0 %v48_v4  ;;  %147 = vadd.xlane.f32.xlu1 %v48_v4  ;;  %s321_s8 = scalar_lea.vmem %s235_s7, 16  ;;  %s325_s9 = scalar_lea.vmem %s235_s7, 32 }
  0x2a   :  { %p322_p2 = scmp.ne.s32.totalorder %s235_s7, %s321_s8  ;;  %p326_p3 = scmp.lt.s32.totalorder %s235_s7, %s235_s7 }
  0x2b   :  { %p327_p4 = scmp.lt.s32.totalorder %s325_s9, %s321_s8 }
  0x2d   :  { %59 = vadd.xlane.f32.xlu0 %v58_v5  ;;  %p328_p5 = por %p327_p4, %p326_p3 }
  0x2e   :  { %v152_v30 = vld [vmem:[#allocation6] sm:$0x1]  ;;  %v178_v6 = vld [vmem:[#allocation5] sm:$0x1] }
  0x2f   :  { %v193_v44 = vld [vmem:[#allocation3] sm:$0x1]  ;;  %p329_p6 = pnand %p328_p5, %p322_p2 }
  0xb6   :  { %v50_v7 = vpop.xlane.xlu0 %49  ;;  %v148_v8 = vpop.xlane.xlu1 %147 }
  0xb7   :  { %v51_v9 = vmax.f32 %v50_v7, 1e-24  ;;  %v149_v10 = vmax.f32 %v148_v8, 1e-24 }
  0xb9   :  { %265 = vrsqrt.f32 %v51_v9 }
  0xba   :  { %v60_v11 = vpop.xlane.xlu0 %59  ;;  %267 = vrsqrt.f32 %v149_v10 }
  0xbb   :  { %v61_v12 = vmax.f32 %v60_v11, 1e-24 }
  0xbd   :  { %269 = vrsqrt.f32 %v61_v12 }
  0xc3   :  { %v266_v13 = vpop.eup %265 }
  0xc4   :  { %v53_v14 = vmul.f32 %v266_v13, %v45_v0  ;;  %v268_v15 = vpop.eup %267 }
  0xc5   :  { %v151_v18 = vmul.f32 %v268_v15, %v45_v0 }
  0xc6   :  { %54 = vst.msk [vmem:[#allocation2] sm:$0xff] %vm47_vm0, %v53_v14 }
  0xc7   :  { %v270_v16 = vpop.eup %269 }
  0xc8   :  { %v63_v17 = vmul.f32 2.0, %v270_v16 }
  0xca   :  { %v64_v19 = vmul.f32 %v63_v17, %v55_v1 }
  0xcc   :  { %v153_v20 = vmul.f32 %v151_v18, %v64_v19 }
  0xcd   :  { %v65_v21 = vld [vmem:[#allocation2] sm:$0xff] }
  0xce   :  { %250 = vmatpush3.xpose.msk.msra.mxu0 %vm47_vm0, %v65_v21  ;;  %v154_v22 = vsel %vm47_vm0, %v153_v20, 0.0 }
  0xcf   :  { %155 = vadd.xlane.f32.xlu0 %v154_v22 }
  0xd1   :  { %252 = vmatmul.mubr.msk.f32.vlgmr.msra.gmra.mrb[0].mxu0 %vm47_vm0, %v64_v19 }
 0x15c   :  { %v156_v23 = vpop.xlane.xlu0 %155 }
 0x15d   :  { %v157_v24 = vrot.slane %v156_v23, 4 }
 0x15f   :  { %v158_v25 = vadd.f32 %v157_v24, %v156_v23 }
 0x161   :  { %v159_v26 = vrot.slane %v158_v25, 2 }
 0x163   :  { %v160_v27 = vadd.f32 %v159_v26, %v158_v25 }
 0x165   :  { %v161_v28 = vrot.slane %v160_v27, 1 }
 0x167   :  { %v162_v29 = vadd.f32 %v161_v28, %v160_v27 }
 0x169   :  { %254 = vpush %v162_v29 }
 0x19a   :  { %s255_s1 = spop %254 }
 0x19b   :  { %v164_v31 = vstv %s255_s1 }
 0x19c   :  { %v165_v32 = vadd.f32 %v164_v31, %v152_v30 }
 0x19e   :  { %167 = vst.msk [vmem:[#allocation6] sm:$0x1] %vm42_vm2, %v165_v32 }
 0x1a4   :  { %v138_v33 = vpop.f32.mrb[0].mxu0 }
 0x1a5   :  { %v246_v34 = vadd.f32 -2.0, %v138_v33  ;;  %v253_v35 = vpop.f32.mrb[1].mxu0  ;;  %v223_v10 = vld [vmem:[#allocation6] sm:$0x1] }
 0x1a6   :  { %v224_v14 = vmul.f32 2.0, %v223_v10 }
 0x1a7   :  { %v169_v36 = vmul.f32 1.442695, %v246_v34 }
 0x1a9   :  { %271 = vpow2.f32 %v169_v36 }
 0x1b3   :  { %v272_v37 = vpop.eup %271 }
 0x1b4   :  { %v172_v38 = vsel %vm171_vm4, %v272_v37, 0.0 }
 0x1b5   :  { %173 = vadd.xlane.f32.xlu1 %v172_v38  ;;  %v194_v39 = vrot.slane %v172_v38, 4 }
 0x1b7   :  { %v195_v40 = vadd.f32 %v194_v39, %v172_v38 }
 0x1b9   :  { %v196_v41 = vrot.slane %v195_v40, 2 }
 0x1bb   :  { %v197_v42 = vadd.f32 %v196_v41, %v195_v40 }
 0x1bd   :  { %v198_v43 = vrot.slane %v197_v42, 1 }
 0x1bf   :  { %v199_v45 = vadd.f32 %v198_v43, %v197_v42 }
 0x1c1   :  { %v200_v46 = vadd.f32 %v199_v45, %v193_v44 }
 0x1c3   :  { %202 = vst.msk [vmem:[#allocation3] sm:$0x1] %vm40_vm3, %v200_v46 }
 0x1ca   :  { %v206_v47 = vld [vmem:[#allocation3] sm:$0x1] }
 0x1cb   :  { %273 = vlog2.f32 %v206_v47 }
 0x1d5   :  { %v274_v48 = vpop.eup %273 }
 0x1d6   :  { %v208_v49 = vmul.f32 0.6931472, %v274_v48 }
 0x1d8   :  { %v209_v50 = vsel %vm40_vm3, %v208_v49, 0.0 }
 0x1d9   :  { %210 = vadd.xlane.f32.xlu0 %v209_v50 }
 0x242   :  { %v174_v51 = vpop.xlane.xlu1 %173 }
 0x243   :  { %275 = vlog2.f32 %v174_v51 }
 0x24d   :  { %v276_v52 = vpop.eup %275 }
 0x24e   :  { %v176_v53 = vmul.f32 0.6931472, %v276_v52 }
 0x250   :  { %v177_v54 = vadd.f32 2.0, %v176_v53 }
 0x252   :  { %v180_v55 = vsel %vm179_vm5, %v177_v54, 0.0 }
 0x253   :  { %181 = vadd.xlane.f32.xlu1 %v180_v55 }
 0x266   :  { %v211_v56 = vpop.xlane.xlu0 %210 }
 0x267   :  { %v212_v57 = vrot.slane %v211_v56, 4 }
 0x269   :  { %v213_v58 = vadd.f32 %v212_v57, %v211_v56 }
 0x26b   :  { %v214_v59 = vrot.slane %v213_v58, 2 }
 0x26d   :  { %v215_v63 = vadd.f32 %v214_v59, %v213_v58 }
 0x26f   :  { %v216_v2 = vrot.slane %v215_v63, 1 }
 0x271   :  { %v217_v5 = vadd.f32 %v216_v2, %v215_v63 }
 0x2e0   :  { %v182_v60 = vpop.xlane.xlu1 %181 }
 0x2e1   :  { %v183_v61 = vrot.slane %v182_v60, 4 }
 0x2e3   :  { %v184_v62 = vadd.f32 %v183_v61, %v182_v60 }
 0x2e5   :  { %v185_v0 = vrot.slane %v184_v62, 2 }
 0x2e7   :  { %v186_v1 = vadd.f32 %v185_v0, %v184_v62 }
 0x2e9   :  { %v187_v3 = vrot.slane %v186_v1, 1 }
 0x2eb   :  { %v188_v4 = vadd.f32 %v187_v3, %v186_v1 }
 0x2ed   :  { %256 = vpush %v188_v4 }
 0x2ee   :  { %258 = vpush %v217_v5 }
 0x31e   :  { %s257_s4 = spop %256 }
 0x31f   :  { %v190_v7 = vstv %s257_s4  ;;  %s259_s5 = spop %258 }
 0x320   :  { %v191_v8 = vadd.f32 %v190_v7, %v178_v6  ;;  %v219_v9 = vstv %s259_s5 }
 0x321   :  { %v220_v11 = vadd.f32 16.0, %v219_v9 }
 0x322   :  { %192 = vst.msk [vmem:[#allocation5] sm:$0x1] %vm42_vm2, %v191_v8 }
 0x329   :  { %v221_v12 = vld [vmem:[#allocation5] sm:$0x1] }
 0x32a   :  { %v222_v13 = vadd.f32 %v221_v12, %v220_v11 }
 0x32c   :  { %v225_v15 = vsub.f32 %v222_v13, %v224_v14 }
 0x32e   :  { %v226_v16 = vmul.f32 0.125, %v225_v15 }
 0x330   :  { %227 = vst.msk [vmem:[#allocation12] sm:$0x1] %vm42_vm2, %v226_v16 }
 0x331   :  { %332 = shalt.err (!%p329_p6)
}
 0x332   :  { %s333_s12 = scalar_lea.hbm %s421_s2, 16 }
 0x333   :  { %p334_p7 = scmp.ne.s32.totalorder %s421_s2, %s333_s12  ;;  %p337_p8 = scmp.lt.u32.totalorder %s333_s12, %s421_s2 }
 0x335   :  { %p339_p9 = pnand %p337_p8, %p334_p7 }
 0x337   :  { %342 = shalt.err (!%p339_p9)
}
 0x338   :  { %237 = dma.vmem_to_hbm [thread:$0]  %s235_s7, 16, %s421_s2, [#allocation9]  }
 0x339   :  { %347 = dma.done.wait [#allocation9], 16  }
 0x33a   :  { %348 = vsyncadd [#allocation9], 4294967280 }
 0x33b   :  { %241 = vsyncpa [#allocation8], 1 }
 0x33c   :  { %242 = vsyncpa [#allocation11], 1 }
 0x33d   :  { %243 = vsyncpa [#allocation9], 1 }

</bundles_post_ra>
